<compile_context>
chip_gen: v6e
topology: v6e:2x2x1
jax: 0.10.0
libtpu: 0.0.40
codegen_flags: <defaults>
</compile_context>

<pallas_src>
import functools

import jax
import jax.numpy as jnp
from jax.experimental import pallas as pl
from jax.experimental.pallas import tpu as pltpu

_EPS = 1e-5                      # nn.BatchNorm1d default
_VMEM_LIMIT = 32 * 1024 * 1024   # valid on v5e/v6e (128 MiB) and v7x (64 MiB)
_TARGET_BLOCK_BYTES = 2 * 1024 * 1024


# --------------------------------------------------------------------------
# Kernels
# --------------------------------------------------------------------------
def _fused_kernel(x_ref, gamma_ref, beta_ref, o_ref, *, n_rows, eps):
    """Small-problem fast path: whole flat x resident in VMEM, single pass."""
    x = x_ref[...].astype(jnp.float32)                   # (N, d)
    s = jnp.sum(x, axis=0, keepdims=True)                # (1, d)
    q = jnp.sum(x * x, axis=0, keepdims=True)            # (1, d)
    inv_n = 1.0 / n_rows
    mean = s * inv_n
    var = jnp.maximum(q * inv_n - mean * mean, 0.0)      # biased, clamped >= 0
    inv_std = jax.lax.rsqrt(var + eps)
    scale = gamma_ref[...] * inv_std
    shift = beta_ref[...] - mean * scale
    o_ref[...] = (x * scale + shift).astype(o_ref.dtype)


def _stats_kernel(x_ref, sum_ref, sumsq_ref):
    """Pass 1: per-(split, sublane, lane) partial sums / sums-of-squares.

    The (1, 8, L) output block is resident across the inner 'arbitrary' axis
    (same block index), so it acts as the accumulator.  Rows are folded onto
    the 8 sublanes so the per-step work is plain VPU adds; the final 8->1
    (and fold) reduction happens once, outside the kernel, on O(d) data.
    """
    i = pl.program_id(1)

    @pl.when(i == 0)
    def _():
        sum_ref[...] = jnp.zeros_like(sum_ref)
        sumsq_ref[...] = jnp.zeros_like(sumsq_ref)

    x = x_ref[...].astype(jnp.float32)                   # (row_tile, L)
    rt, lanes = x.shape
    xr = x.reshape(1, rt // 8, 8, lanes)                 # split leading dim only
    sum_ref[...] += jnp.sum(xr, axis=1)                  # (1, 8, L)
    sumsq_ref[...] += jnp.sum(xr * xr, axis=1)


def _normalize_kernel(x_ref, scale_ref, shift_ref, o_ref):
    """Pass 2: y = x * scale + shift (affine + normalization pre-fused)."""
    x = x_ref[...].astype(jnp.float32)
    o_ref[...] = (x * scale_ref[...] + shift_ref[...]).astype(o_ref.dtype)


# --------------------------------------------------------------------------
# Wrapper
# --------------------------------------------------------------------------
def seq_bn_forward(x, gamma, beta, *, eps=_EPS,
                   small_bytes_limit=_TARGET_BLOCK_BYTES,
                   max_row_tile=2048):
    """SeqBN forward.  gamma/beta: shape (d_model,) or (1, d_model)."""
    d = x.shape[-1]
    orig_shape = x.shape
    orig_dtype = x.dtype

    flat = x.reshape(-1, d)
    n = flat.shape[0]
    itemsize = jnp.dtype(orig_dtype).itemsize

    gamma2 = jnp.asarray(gamma, jnp.float32).reshape(1, d)
    beta2 = jnp.asarray(beta, jnp.float32).reshape(1, d)

    # ---- Fast path: whole problem fits comfortably in VMEM -> single kernel.
    if n * d * max(itemsize, 4) <= small_bytes_limit:
        out = pl.pallas_call(
            functools.partial(_fused_kernel, n_rows=float(n), eps=eps),
            out_shape=jax.ShapeDtypeStruct((n, d), orig_dtype),
            grid_spec=pltpu.PrefetchScalarGridSpec(
                num_scalar_prefetch=0,
                grid=(1,),
                in_specs=[
                    pl.BlockSpec((n, d), lambda i: (0, 0)),
                    pl.BlockSpec((1, d), lambda i: (0, 0)),
                    pl.BlockSpec((1, d), lambda i: (0, 0)),
                ],
                out_specs=pl.BlockSpec((n, d), lambda i: (0, 0)),
            ),
            compiler_params=pltpu.CompilerParams(
                dimension_semantics=("arbitrary",),
                vmem_limit_bytes=_VMEM_LIMIT,
            ),
        )(flat, gamma2, beta2)
        return out.reshape(orig_shape)

    # ---- Lane folding for narrow feature dims (lane-dense loads/stores).
    if d < 128 and 128 % d == 0:
        fold_k = 128 // d
    else:
        fold_k = 1
    lanes = fold_k * d

    # ---- Row-tile selection: ~2 MiB blocks, balanced across the grid.
    sublane = max(8, 32 // itemsize)          # 8 (f32), 16 (bf16), 32 (int8)
    rows_folded = pl.cdiv(n, fold_k)          # folded rows before padding
    rows_target = max(sublane,
                      min(max_row_tile,
                          _TARGET_BLOCK_BYTES // max(1, lanes * itemsize)))
    rows_target = max(sublane, (rows_target // sublane) * sublane)
    num_tiles = pl.cdiv(rows_folded, rows_target)
    if num_tiles >= 2:
        num_tiles = 2 * pl.cdiv(num_tiles, 2)  # even -> 2-way stats split
        n_splits = 2
    else:
        n_splits = 1
    row_tile = max(sublane,
                   sublane * pl.cdiv(pl.cdiv(rows_folded, num_tiles), sublane))
    padded_rows = num_tiles * row_tile
    padded_n = padded_rows * fold_k
    if padded_n != n:
        # Zero rows contribute nothing to sum / sum-of-squares.
        flat = jnp.pad(flat, ((0, padded_n - n), (0, 0)))
    xf = flat.reshape(padded_rows, lanes)
    tiles_per_split = num_tiles // n_splits

    # ---- Pass 1: partial per-feature statistics -----------------------------
    part_shape = jax.ShapeDtypeStruct((n_splits, 8, lanes), jnp.float32)
    psum, psumsq = pl.pallas_call(
        _stats_kernel,
        out_shape=(part_shape, part_shape),
        grid_spec=pltpu.PrefetchScalarGridSpec(
            num_scalar_prefetch=0,
            grid=(n_splits, tiles_per_split),
            in_specs=[
                pl.BlockSpec((row_tile, lanes),
                             lambda c, i: (c * tiles_per_split + i, 0)),
            ],
            out_specs=[
                pl.BlockSpec((1, 8, lanes), lambda c, i: (c, 0, 0)),
                pl.BlockSpec((1, 8, lanes), lambda c, i: (c, 0, 0)),
            ],
        ),
        compiler_params=pltpu.CompilerParams(
            dimension_semantics=("parallel", "arbitrary"),
            vmem_limit_bytes=_VMEM_LIMIT,
        ),
    )(xf)

    # ---- Tiny finalize (O(d_model)): combine partials, build scale/shift ----
    s_tot = jnp.sum(psum.reshape(n_splits * 8, lanes), axis=0)    # (lanes,)
    q_tot = jnp.sum(psumsq.reshape(n_splits * 8, lanes), axis=0)
    s_feat = jnp.sum(s_tot.reshape(fold_k, d), axis=0)            # (d,)
    q_feat = jnp.sum(q_tot.reshape(fold_k, d), axis=0)
    inv_n = 1.0 / float(n)                                        # true N
    mean = s_feat * inv_n
    var = jnp.maximum(q_feat * inv_n - mean * mean, 0.0)
    inv_std = jax.lax.rsqrt(var + eps)
    scale = gamma2.reshape(-1) * inv_std                          # (d,)
    shift = beta2.reshape(-1) - mean * scale
    scale_l = jnp.tile(scale, fold_k).reshape(1, lanes)
    shift_l = jnp.tile(shift, fold_k).reshape(1, lanes)

    # ---- Pass 2: y = x * scale + shift --------------------------------------
    out = pl.pallas_call(
        _normalize_kernel,
        out_shape=jax.ShapeDtypeStruct((padded_rows, lanes), orig_dtype),
        grid_spec=pltpu.PrefetchScalarGridSpec(
            num_scalar_prefetch=0,
            grid=(num_tiles,),
            in_specs=[
                pl.BlockSpec((row_tile, lanes), lambda i: (i, 0)),
                pl.BlockSpec((1, lanes), lambda i: (0, 0)),
                pl.BlockSpec((1, lanes), lambda i: (0, 0)),
            ],
            out_specs=pl.BlockSpec((row_tile, lanes), lambda i: (i, 0)),
        ),
        compiler_params=pltpu.CompilerParams(
            dimension_semantics=("parallel",),
            vmem_limit_bytes=_VMEM_LIMIT,
        ),
    )(xf, scale_l, shift_l)

    out_flat = out.reshape(padded_n, d)[:n]
    return out_flat.reshape(orig_shape)


# --------------------------------------------------------------------------
# Reference & test
# --------------------------------------------------------------------------
def _reference(x, gamma, beta, eps=_EPS):
    """Pure-JAX reference matching PyTorch BatchNorm1d training-mode forward."""
    d = x.shape[-1]
    flat = x.reshape(-1, d).astype(jnp.float32)
    mean = flat.mean(axis=0, keepdims=True)
    var = ((flat - mean) ** 2).mean(axis=0, keepdims=True)   # biased
    y = (flat - mean) / jnp.sqrt(var + eps)
    y = y * jnp.asarray(gamma, jnp.float32).reshape(1, d) \
          + jnp.asarray(beta, jnp.float32).reshape(1, d)
    return y.reshape(x.shape).astype(x.dtype)


def _run_case(key, shape, **kwargs):
    seq, batch, d_model = shape
    kx, kg, kb = jax.random.split(key, 3)
    x = jax.random.normal(kx, (seq, batch, d_model), dtype=jnp.float32)
    gamma = (1.0 + 0.1 * jax.random.normal(kg, (d_model,))).astype(jnp.float32)
    beta = (0.1 * jax.random.normal(kb, (d_model,))).astype(jnp.float32)

    out = seq_bn_forward(x, gamma, beta, **kwargs)
    out = jax.block_until_ready(out)

    ref = _reference(x, gamma, beta)
    assert out.shape == x.shape and out.dtype == x.dtype
    assert jnp.allclose(out, ref, atol=1e-4, rtol=1e-4), f"mismatch for {shape}"


if __name__ == "__main__":
    root = jax.random.PRNGKey(0)
    k1, k2, k3, k4 = jax.random.split(root, 4)

    # A: tiny problem -> fused single-kernel fast path (the module's test size).
    _run_case(k1, (8, 2, 32))
    # C: non-folded lane width (< 128, does not divide 128), two-pass path.
    _run_case(k2, (100, 4, 96), small_bytes_limit=0)
    # D: folded lanes (d=64 -> 128), multi-tile grid + 2-way stats split.
    _run_case(k3, (64, 8, 64), small_bytes_limit=0, max_row_tile=64)
    # E: folding + zero-padding of a ragged row count + 2-way stats split.
    _run_case(k4, (50, 3, 32), small_bytes_limit=0, max_row_tile=16)

    print("KERNEL_OK")
</pallas_src>

<mosaic_0001>
module attributes {stable_mosaic.version = 11 : i64} {
  func.func @_fused_kernel(%arg0: i32, %arg1: memref<16x32xf32, #tpu.memory_space<vmem>>, %arg2: memref<1x32xf32, #tpu.memory_space<vmem>>, %arg3: memref<1x32xf32, #tpu.memory_space<vmem>>, %arg4: memref<16x32xf32, #tpu.memory_space<vmem>>) attributes {dimension_semantics = [#tpu.dimension_semantics<arbitrary>], iteration_bounds = array<i64: 1>, scalar_prefetch = 0 : i64, scratch_operands = 0 : i64, tpu.core_type = #tpu.core_type<tc>, window_params = [{pipeline_mode = #tpu.pipeline_mode<synchronous>, transform_indices = @transform_0, window_bounds = array<i64: 16, 32>}, {pipeline_mode = #tpu.pipeline_mode<synchronous>, transform_indices = @transform_1, window_bounds = array<i64: 1, 32>}, {pipeline_mode = #tpu.pipeline_mode<synchronous>, transform_indices = @transform_2, window_bounds = array<i64: 1, 32>}, {pipeline_mode = #tpu.pipeline_mode<synchronous>, transform_indices = @transform_3, window_bounds = array<i64: 16, 32>}]} {
    %c0 = arith.constant 0 : index
    %c0_0 = arith.constant 0 : index
    %0 = vector.load %arg1[%c0, %c0_0] : memref<16x32xf32, #tpu.memory_space<vmem>>, vector<16x32xf32>
    %cst = arith.constant dense<0.000000e+00> : vector<32xf32>
    %1 = vector.multi_reduction <add>, %0, %cst [0] : vector<16x32xf32> to vector<32xf32>
    %2 = vector.shape_cast %1 : vector<32xf32> to vector<1x32xf32>
    %3 = arith.mulf %0, %0 : vector<16x32xf32>
    %cst_1 = arith.constant dense<0.000000e+00> : vector<32xf32>
    %4 = vector.multi_reduction <add>, %3, %cst_1 [0] : vector<16x32xf32> to vector<32xf32>
    %5 = vector.shape_cast %4 : vector<32xf32> to vector<1x32xf32>
    %cst_2 = arith.constant 6.250000e-02 : f32
    %6 = vector.broadcast %cst_2 : f32 to vector<1x32xf32>
    %7 = arith.mulf %2, %6 : vector<1x32xf32>
    %cst_3 = arith.constant 6.250000e-02 : f32
    %8 = vector.broadcast %cst_3 : f32 to vector<1x32xf32>
    %9 = arith.mulf %5, %8 : vector<1x32xf32>
    %10 = arith.mulf %7, %7 : vector<1x32xf32>
    %11 = arith.subf %9, %10 : vector<1x32xf32>
    %cst_4 = arith.constant 0.000000e+00 : f32
    %12 = vector.broadcast %cst_4 : f32 to vector<1x32xf32>
    %13 = arith.maximumf %11, %12 : vector<1x32xf32>
    %cst_5 = arith.constant 9.99999974E-6 : f32
    %14 = vector.broadcast %cst_5 : f32 to vector<1x32xf32>
    %15 = arith.addf %13, %14 : vector<1x32xf32>
    %16 = math.rsqrt %15 : vector<1x32xf32>
    %c0_6 = arith.constant 0 : index
    %c0_7 = arith.constant 0 : index
    %17 = vector.load %arg2[%c0_6, %c0_7] : memref<1x32xf32, #tpu.memory_space<vmem>>, vector<1x32xf32>
    %18 = arith.mulf %17, %16 : vector<1x32xf32>
    %c0_8 = arith.constant 0 : index
    %c0_9 = arith.constant 0 : index
    %19 = vector.load %arg3[%c0_8, %c0_9] : memref<1x32xf32, #tpu.memory_space<vmem>>, vector<1x32xf32>
    %20 = arith.mulf %7, %18 : vector<1x32xf32>
    %21 = arith.subf %19, %20 : vector<1x32xf32>
    %22 = vector.broadcast %18 : vector<1x32xf32> to vector<16x32xf32>
    %23 = arith.mulf %0, %22 : vector<16x32xf32>
    %24 = vector.broadcast %21 : vector<1x32xf32> to vector<16x32xf32>
    %25 = arith.addf %23, %24 : vector<16x32xf32>
    %c0_10 = arith.constant 0 : index
    %c0_11 = arith.constant 0 : index
    %26 = vector.load %arg4[%c0_10, %c0_11] : memref<16x32xf32, #tpu.memory_space<vmem>>, vector<16x32xf32>
    tpu.vector_store %arg4[%c0_10, %c0_11], %25 {strides = array<i32>} : memref<16x32xf32, #tpu.memory_space<vmem>>, vector<16x32xf32>,
    return
  }
  func.func @transform_0(%arg0: i32) -> (i32, i32) {
    %c0_i32 = arith.constant 0 : i32
    %c0_i32_0 = arith.constant 0 : i32
    %c0_i32_1 = arith.constant 0 : i32
    return %c0_i32, %c0_i32_0 : i32, i32
  }
  func.func @transform_1(%arg0: i32) -> (i32, i32) {
    %c0_i32 = arith.constant 0 : i32
    %c0_i32_0 = arith.constant 0 : i32
    %c0_i32_1 = arith.constant 0 : i32
    return %c0_i32, %c0_i32_0 : i32, i32
  }
  func.func @transform_2(%arg0: i32) -> (i32, i32) {
    %c0_i32 = arith.constant 0 : i32
    %c0_i32_0 = arith.constant 0 : i32
    %c0_i32_1 = arith.constant 0 : i32
    return %c0_i32, %c0_i32_0 : i32, i32
  }
  func.func @transform_3(%arg0: i32) -> (i32, i32) {
    %c0_i32 = arith.constant 0 : i32
    %c0_i32_0 = arith.constant 0 : i32
    %c0_i32_1 = arith.constant 0 : i32
    return %c0_i32, %c0_i32_0 : i32, i32
  }
}

</mosaic_0001>

<bundles_post_ra>
// kernel: tpu_custom_call.1
= control target key start
LH: loop header
LB: loop body
LE: loop exit
PB: predicated region body
PF: predicated region fallthrough
CT: control target
= control target key end

     0   :  { %8 = vsyncpa [#allocation3], 0  ;;  %s197_s0 = inlined_call_operand.hbm [shape: f32[16,32], index: 0, kind: input, shape index: {}]   ;;  %s198_s1 = inlined_call_operand.vmem [shape: f32[1,32], index: 1, kind: input, shape index: {}]   ;;  %s199_s2 = inlined_call_operand.vmem [shape: f32[1,32], index: 2, kind: input, shape index: {}]   ;;  %s200_s3 = inlined_call_operand.hbm [shape: f32[16,32], index: 3, kind: output, shape index: {}]  }
   0x1   :  { %9 = vsyncpa [#allocation4], 0  ;;  %s149_s12 = smov [#allocation2]  }
   0x2   :  { %s15_s13 = sshll.u32 %s149_s12, 4  ;;  %s16_s13 = int_to_ptr.vmem [resolvable:$true] %s15_s13 }
   0x3   :  { %s113_s14 = scalar_lea.vmem %s16_s13, 256  ;;  %p118_p1 = scmp.lt.s32.totalorder %s16_s13, %s16_s13 }
   0x4   :  { %p114_p0 = scmp.ne.s32.totalorder %s16_s13, %s113_s14  ;;  %p119_p2 = scmp.lt.s32.totalorder %s113_s14, %s113_s14 }
   0x6   :  { %p120_p3 = por %p119_p2, %p118_p1 }
   0x8   :  { %p121_p4 = pnand %p120_p3, %p114_p0 }
   0xa   :  { %124 = shalt.err (!%p121_p4)
}
   0xb   :  { %s150_s15 = smov 128   ;;  %s151_s16 = smov 8  }
   0xc   :  { %21 = dma.hbm_to_vmem [thread:$0]  %s197_s0, 256, %s16_s13, [#allocation3], %s150_s15, %s150_s15, %s151_s16  }
   0xd   :  { %145 = dma.done.wait [#allocation3], 256  }
   0xe   :  { %146 = vsyncadd [#allocation3], 4294967040  ;;  %vm31_vm0 = vcmask 261120   ;;  %v29_v0 = vld [vmem:[#allocation2] sm:$0xff]  ;;  %v30_v1 = vld [vmem:[#allocation2 + $0x8] sm:$0xff]  ;;  %v65_v28 = vlaneseq  ;;  %s152_s22 = smov [#allocation5]  }
   0xf   :  { %v32_v2 = vsel %vm31_vm0, %v29_v0, 0.0  ;;  %v33_v3 = vsel %vm31_vm0, %v30_v1, 0.0  ;;  %v41_v4 = vmul.f32 %v29_v0, %v29_v0  ;;  %v42_v5 = vmul.f32 %v30_v1, %v30_v1  ;;  %v59_v30 = vld [vmem:[%s198_s1] sm:$0x1]  ;;  %s87_s23 = sshll.u32 %s152_s22, 4  ;;  %s88_s23 = int_to_ptr.vmem [resolvable:$true] %s87_s23 }
  0x10   :  { %v34_v6 = vadd.f32 %v33_v3, %v32_v2  ;;  %v66_v29 = vshrl.u32 %v65_v28, 7  ;;  %v61_v34 = vld [vmem:[%s199_s2] sm:$0x1]  ;;  %s125_s1 = scalar_lea.vmem %s88_s23, 256  ;;  %p130_p6 = scmp.lt.s32.totalorder %s88_s23, %s88_s23 }
  0x11   :  { %v43_v7 = vsel %vm31_vm0, %v41_v4, 0.0  ;;  %v44_v8 = vsel %vm31_vm0, %v42_v5, 0.0  ;;  %p126_p5 = scmp.ne.s32.totalorder %s88_s23, %s125_s1  ;;  %p131_p7 = scmp.lt.s32.totalorder %s125_s1, %s125_s1 }
  0x12   :  { %v35_v9 = vrot.slane %v34_v6, 4  ;;  %v45_v10 = vadd.f32 %v44_v8, %v43_v7  ;;  %v67_v31 = vsub.s32 0, %v66_v29 }
  0x13   :  { %p132_p8 = por %p131_p7, %p130_p6 }
  0x14   :  { %v36_v11 = vadd.f32 %v35_v9, %v34_v6  ;;  %v46_v12 = vrot.slane %v45_v10, 4 }
  0x15   :  { %p133_p9 = pnand %p132_p8, %p126_p5 }
  0x16   :  { %v37_v13 = vrot.slane %v36_v11, 2  ;;  %v47_v14 = vadd.f32 %v46_v12, %v45_v10 }
  0x18   :  { %v38_v15 = vadd.f32 %v37_v13, %v36_v11  ;;  %v48_v16 = vrot.slane %v47_v14, 2 }
  0x1a   :  { %v39_v17 = vrot.slane %v38_v15, 1  ;;  %v49_v18 = vadd.f32 %v48_v16, %v47_v14 }
  0x1c   :  { %v40_v19 = vadd.f32 %v39_v17, %v38_v15  ;;  %v50_v20 = vrot.slane %v49_v18, 1 }
  0x1e   :  { %v51_v21 = vadd.f32 %v50_v20, %v49_v18  ;;  %v52_v22 = vmul.f32 0.0625, %v40_v19 }
  0x20   :  { %v53_v23 = vmul.f32 0.0625, %v51_v21  ;;  %v54_v24 = vmul.f32 %v52_v22, %v52_v22 }
  0x22   :  { %v55_v25 = vsub.f32 %v53_v23, %v54_v24 }
  0x24   :  { %v56_v26 = vmax.f32 %v55_v25, 0.0 }
  0x26   :  { %v57_v27 = vadd.f32 1e-05, %v56_v26 }
  0x28   :  { %103 = vrsqrt.f32 %v57_v27 }
  0x35   :  { %v104_v32 = vpop.eup %103 }
  0x36   :  { %v60_v33 = vmul.f32 %v104_v32, %v59_v30 }
  0x38   :  { %v62_v35 = vmul.f32 %v60_v33, %v52_v22  ;;  %v68_v36 = vrot.slane %v60_v33, %v67_v31 }
  0x3a   :  { %v63_v37 = vsub.f32 %v61_v34, %v62_v35  ;;  %v70_v38 = vmul.f32 %v68_v36, %v29_v0  ;;  %v71_v39 = vmul.f32 %v68_v36, %v30_v1 }
  0x3c   :  { %v76_v40 = vrot.slane %v63_v37, %v67_v31 }
  0x3e   :  { %v78_v41 = vadd.f32 %v76_v40, %v70_v38  ;;  %v79_v42 = vadd.f32 %v76_v40, %v71_v39 }
  0x40   :  { %80 = vst.msk [vmem:[#allocation5] sm:$0xff] %vm31_vm0, %v78_v41  ;;  %81 = vst.msk [vmem:[#allocation5 + $0x8] sm:$0xff] %vm31_vm0, %v79_v42 }
  0x41   :  { %136 = shalt.err (!%p133_p9)
}
  0x42   :  { %93 = dma.vmem_to_hbm [thread:$0]  %s88_s23, 256, %s200_s3, [#allocation4], %s150_s15, %s150_s15, %s151_s16  }
  0x43   :  { %147 = dma.done.wait [#allocation4], 256  }
  0x44   :  { %148 = vsyncadd [#allocation4], 4294967040 }
  0x45   :  { %97 = vsyncpa [#allocation3], 1 }
  0x46   :  { %98 = vsyncpa [#allocation4], 1 }

</bundles_post_ra>
